<compile_context>
chip_gen: v6e
topology: v6e:2x2x1
jax: 0.10.0
libtpu: 0.0.40
codegen_flags: <defaults>
</compile_context>

<pallas_src>
import jax
import jax.numpy as jnp
from jax.experimental import pallas as pl
from jax.experimental.pallas import tpu as pltpu


def _additive_attention_kernel(cv_ref, w_ref, b_ref, q_ref, out_ref):
    # cv_ref: (TB, S, C)  w_ref: (C, Q)  b_ref: (1, Q)  q_ref: (1, Q)  out_ref: (TB, C)
    tb, S, C = cv_ref.shape
    Q = w_ref.shape[1]

    cv = cv_ref[...]                                   # (TB, S, C), native dtype
    cv2 = cv.reshape(tb * S, C)                        # sublane merge (C stays the lane dim)

    # temp = tanh(cv @ W + b)  -- single (TB*S, C) x (C, Q) MXU matmul, f32 accumulate.
    temp = jnp.tanh(
        jnp.dot(cv2, w_ref[...], preferred_element_type=jnp.float32) + b_ref[...]
    )                                                  # (TB*S, Q) f32

    # scores = temp @ query_vector, done on VPU + XLU lane reduce (avoids an N=1 MXU pass).
    temp3 = temp.reshape(tb, S, Q)
    scores = jnp.sum(temp3 * q_ref[...][None, :, :], axis=-1)      # (TB, S) f32

    # Per-batch-row softmax over the sequence axis (PyTorch dim=1).
    m = jnp.max(scores, axis=1, keepdims=True)
    e = jnp.exp(scores - m)
    denom = jnp.sum(e, axis=1, keepdims=True)
    weights = e * pl.reciprocal(denom, approx=True)                # (TB, S)

    # Weighted sum over the sequence axis (XLU sublane reduce) -> dense (TB, C) slab store.
    out = jnp.sum(cv.astype(jnp.float32) * weights[:, :, None], axis=1)
    out_ref[...] = out.astype(out_ref.dtype)


def additive_attention(candidate_vector, w_t, bias, query_vector, *, tb=None):
    """candidate_vector: [B, S, C], w_t: [C, Q], bias: [Q], query_vector: [Q, 1] -> [B, C]."""
    B, S, C = candidate_vector.shape
    Cq, Q = w_t.shape
    assert Cq == C

    bias2d = bias.reshape(1, Q)
    q_row = query_vector.reshape(1, Q)                 # pass query as a lane-dense row

    # Pick TB: the kernel is memory-bound, so take the biggest batch block that keeps the
    # double-buffered cv slab tiny (~1 MiB target, hard cap 1024 rows), while also covering
    # at least ~256 MXU rows per step.  Clamp to the batch; keep TB a multiple of 8 when
    # the grid has >1 step so the (TB, C) output block satisfies the (8, 128) tiling rule.
    if tb is None:
        itemsize = jnp.dtype(candidate_vector.dtype).itemsize
        per_row_bytes = max(1, S * C * itemsize)       # bytes of cv per batch row
        tb = max(256 // max(S, 1), (1 << 20) // per_row_bytes, 1)
        tb = min(tb, 1024)
    if tb >= B:
        tb = B                                         # single block == full extent (legal)
    else:
        tb = max(8, (tb // 8) * 8)

    B_pad = pl.cdiv(B, tb) * tb
    cv = candidate_vector
    if B_pad != B:
        # Zero padding is safe: padded rows give a finite softmax and a zero weighted sum,
        # and their outputs are sliced off below.
        cv = jnp.pad(cv, ((0, B_pad - B), (0, 0), (0, 0)))

    out = pl.pallas_call(
        _additive_attention_kernel,
        out_shape=jax.ShapeDtypeStruct((B_pad, C), candidate_vector.dtype),
        grid_spec=pltpu.PrefetchScalarGridSpec(
            num_scalar_prefetch=0,
            grid=(B_pad // tb,),
            in_specs=[
                pl.BlockSpec((tb, S, C), lambda b: (b, 0, 0)),   # batched cv slab
                pl.BlockSpec((C, Q), lambda b: (0, 0)),          # linear weight (resident)
                pl.BlockSpec((1, Q), lambda b: (0, 0)),          # linear bias (resident)
                pl.BlockSpec((1, Q), lambda b: (0, 0)),          # query row (resident)
            ],
            out_specs=pl.BlockSpec((tb, C), lambda b: (b, 0)),   # dense (TB, C) writeback
        ),
        compiler_params=pltpu.CompilerParams(
            dimension_semantics=("parallel",),
        ),
    )(cv, w_t, bias2d, q_row)
    return out[:B]


def _reference(candidate_vector, w_t, bias, query_vector):
    temp = jnp.tanh(jnp.einsum("bsc,cq->bsq", candidate_vector, w_t) + bias)
    scores = jnp.einsum("bsq,qo->bso", temp, query_vector)          # [B, S, 1]
    weights = jax.nn.softmax(scores, axis=1)
    return jnp.sum(candidate_vector * weights, axis=1)


def _check(B, S, C, Q, key, tb=None):
    k_cv, k_w, k_b, k_q = jax.random.split(key, 4)
    candidate_vector = jax.random.normal(k_cv, (B, S, C), dtype=jnp.float32)

    # nn.Linear(C, Q) default init bounds; query_vector xavier_uniform([Q, 1]).
    w_bound = (1.0 / C) ** 0.5
    linear_w = jax.random.uniform(k_w, (Q, C), minval=-w_bound, maxval=w_bound,
                                  dtype=jnp.float32)                # PyTorch stores [out, in]
    linear_b = jax.random.uniform(k_b, (Q,), minval=-w_bound, maxval=w_bound,
                                  dtype=jnp.float32)
    q_bound = (6.0 / (Q + 1)) ** 0.5
    query_vector = jax.random.uniform(k_q, (Q, 1), minval=-q_bound, maxval=q_bound,
                                      dtype=jnp.float32)

    w_t = linear_w.T                                                # [C, Q]

    out = additive_attention(candidate_vector, w_t, linear_b, query_vector, tb=tb)
    out = jax.block_until_ready(out)

    ref = _reference(candidate_vector, w_t, linear_b, query_vector)
    assert out.shape == (B, C)
    # Tolerance loosened slightly because the softmax denominator uses the EUP
    # approximate reciprocal (pl.reciprocal(..., approx=True)).
    assert jnp.allclose(out, ref, atol=2e-3, rtol=2e-3), "Pallas output mismatch vs reference"


if __name__ == "__main__":
    key = jax.random.PRNGKey(0)
    k1, k2, k3 = jax.random.split(key, 3)

    # Small shapes consistent with the module: [batch, seq, candidate_vector_dim].
    _check(B=2, S=8, C=32, Q=32, key=k1)              # single-block path (auto TB)
    _check(B=50, S=8, C=32, Q=32, key=k2)             # auto TB -> single block, no padding
    _check(B=50, S=8, C=32, Q=32, key=k3, tb=16)      # forced multi-block + padded path

    print("KERNEL_OK")
</pallas_src>

<mosaic_0001>
module attributes {stable_mosaic.version = 11 : i64} {
  func.func @_additive_attention_kernel(%arg0: i32, %arg1: memref<2x8x32xf32, #tpu.memory_space<vmem>>, %arg2: memref<32x32xf32, #tpu.memory_space<vmem>>, %arg3: memref<1x32xf32, #tpu.memory_space<vmem>>, %arg4: memref<1x32xf32, #tpu.memory_space<vmem>>, %arg5: memref<2x32xf32, #tpu.memory_space<vmem>>) attributes {dimension_semantics = [#tpu.dimension_semantics<parallel>], iteration_bounds = array<i64: 1>, scalar_prefetch = 0 : i64, scratch_operands = 0 : i64, tpu.core_type = #tpu.core_type<tc>, window_params = [{transform_indices = @transform_0, window_bounds = array<i64: 2, 8, 32>}, {pipeline_mode = #tpu.pipeline_mode<synchronous>, transform_indices = @transform_1, window_bounds = array<i64: 32, 32>}, {pipeline_mode = #tpu.pipeline_mode<synchronous>, transform_indices = @transform_2, window_bounds = array<i64: 1, 32>}, {pipeline_mode = #tpu.pipeline_mode<synchronous>, transform_indices = @transform_3, window_bounds = array<i64: 1, 32>}, {transform_indices = @transform_4, window_bounds = array<i64: 2, 32>}]} {
    %c0 = arith.constant 0 : index
    %c0_0 = arith.constant 0 : index
    %c0_1 = arith.constant 0 : index
    %0 = vector.load %arg1[%c0, %c0_0, %c0_1] : memref<2x8x32xf32, #tpu.memory_space<vmem>>, vector<2x8x32xf32>
    %1 = vector.shape_cast %0 : vector<2x8x32xf32> to vector<16x32xf32>
    %c0_2 = arith.constant 0 : index
    %c0_3 = arith.constant 0 : index
    %2 = vector.load %arg2[%c0_2, %c0_3] : memref<32x32xf32, #tpu.memory_space<vmem>>, vector<32x32xf32>
    %cst = arith.constant dense<0.000000e+00> : vector<16x32xf32>
    %3 = tpu.matmul %1, %2, %cst {dimension_numbers = #tpu.dot_dimension_numbers<[1], [0], [0], [1], [0, 0, 1, 1], [], []>} : vector<16x32xf32>, vector<32x32xf32>, vector<16x32xf32> -> vector<16x32xf32>
    %c0_4 = arith.constant 0 : index
    %c0_5 = arith.constant 0 : index
    %4 = vector.load %arg3[%c0_4, %c0_5] : memref<1x32xf32, #tpu.memory_space<vmem>>, vector<1x32xf32>
    %5 = vector.broadcast %4 : vector<1x32xf32> to vector<16x32xf32>
    %6 = arith.addf %3, %5 : vector<16x32xf32>
    %7 = math.tanh %6 : vector<16x32xf32>
    %8 = vector.shape_cast %7 : vector<16x32xf32> to vector<2x8x32xf32>
    %c0_6 = arith.constant 0 : index
    %c0_7 = arith.constant 0 : index
    %9 = vector.load %arg4[%c0_6, %c0_7] : memref<1x32xf32, #tpu.memory_space<vmem>>, vector<1x32xf32>
    %10 = vector.shape_cast %9 : vector<1x32xf32> to vector<1x1x32xf32>
    %11 = vector.broadcast %10 : vector<1x1x32xf32> to vector<2x8x32xf32>
    %12 = arith.mulf %8, %11 : vector<2x8x32xf32>
    %cst_8 = arith.constant dense<0.000000e+00> : vector<2x8xf32>
    %13 = vector.multi_reduction <add>, %12, %cst_8 [2] : vector<2x8x32xf32> to vector<2x8xf32>
    %cst_9 = arith.constant dense<0xFF800000> : vector<2xf32>
    %14 = vector.multi_reduction <maximumf>, %13, %cst_9 [1] : vector<2x8xf32> to vector<2xf32>
    %15 = vector.shape_cast %14 : vector<2xf32> to vector<2x1xf32>
    %16 = vector.broadcast %15 : vector<2x1xf32> to vector<2x8xf32>
    %17 = arith.subf %13, %16 : vector<2x8xf32>
    %18 = math.exp %17 : vector<2x8xf32>
    %cst_10 = arith.constant dense<0.000000e+00> : vector<2xf32>
    %19 = vector.multi_reduction <add>, %18, %cst_10 [1] : vector<2x8xf32> to vector<2xf32>
    %20 = vector.shape_cast %19 : vector<2xf32> to vector<2x1xf32>
    %21 = tpu.reciprocal %20 {approx = true} : vector<2x1xf32> -> vector<2x1xf32>
    %22 = vector.broadcast %21 : vector<2x1xf32> to vector<2x8xf32>
    %23 = arith.mulf %18, %22 : vector<2x8xf32>
    %24 = vector.shape_cast %23 : vector<2x8xf32> to vector<2x8x1xf32>
    %25 = vector.broadcast %24 : vector<2x8x1xf32> to vector<2x8x32xf32>
    %26 = arith.mulf %0, %25 : vector<2x8x32xf32>
    %cst_11 = arith.constant dense<0.000000e+00> : vector<2x32xf32>
    %27 = vector.multi_reduction <add>, %26, %cst_11 [1] : vector<2x8x32xf32> to vector<2x32xf32>
    %c0_12 = arith.constant 0 : index
    %c0_13 = arith.constant 0 : index
    %28 = vector.load %arg5[%c0_12, %c0_13] : memref<2x32xf32, #tpu.memory_space<vmem>>, vector<2x32xf32>
    tpu.vector_store %arg5[%c0_12, %c0_13], %27 {strides = array<i32>} : memref<2x32xf32, #tpu.memory_space<vmem>>, vector<2x32xf32>,
    return
  }
  func.func @transform_0(%arg0: i32) -> (i32, i32, i32) {
    %c0_i32 = arith.constant 0 : i32
    %c0_i32_0 = arith.constant 0 : i32
    %c0_i32_1 = arith.constant 0 : i32
    return %arg0, %c0_i32, %c0_i32_0 : i32, i32, i32
  }
  func.func @transform_1(%arg0: i32) -> (i32, i32) {
    %c0_i32 = arith.constant 0 : i32
    %c0_i32_0 = arith.constant 0 : i32
    %c0_i32_1 = arith.constant 0 : i32
    return %c0_i32, %c0_i32_0 : i32, i32
  }
  func.func @transform_2(%arg0: i32) -> (i32, i32) {
    %c0_i32 = arith.constant 0 : i32
    %c0_i32_0 = arith.constant 0 : i32
    %c0_i32_1 = arith.constant 0 : i32
    return %c0_i32, %c0_i32_0 : i32, i32
  }
  func.func @transform_3(%arg0: i32) -> (i32, i32) {
    %c0_i32 = arith.constant 0 : i32
    %c0_i32_0 = arith.constant 0 : i32
    %c0_i32_1 = arith.constant 0 : i32
    return %c0_i32, %c0_i32_0 : i32, i32
  }
  func.func @transform_4(%arg0: i32) -> (i32, i32) {
    %c0_i32 = arith.constant 0 : i32
    %c0_i32_0 = arith.constant 0 : i32
    return %arg0, %c0_i32 : i32, i32
  }
}

</mosaic_0001>

<bundles_post_ra>
// kernel: tpu_custom_call.1
= control target key start
LH: loop header
LB: loop body
LE: loop exit
PB: predicated region body
PF: predicated region fallthrough
CT: control target
= control target key end

     0   :  { %9 = vsyncpa [#allocation3], 0  ;;  %s447_s0 = inlined_call_operand.hbm [shape: f32[2,8,32], index: 0, kind: input, shape index: {}]   ;;  %s448_s1 = inlined_call_operand.hbm [shape: f32[32,32], index: 1, kind: input, shape index: {}]   ;;  %s449_s2 = inlined_call_operand.vmem [shape: f32[1,32], index: 2, kind: input, shape index: {}]   ;;  %s450_s3 = inlined_call_operand.vmem [shape: f32[1,32], index: 3, kind: input, shape index: {}]   ;;  %s451_s4 = inlined_call_operand.hbm [shape: f32[2,32], index: 4, kind: output, shape index: {}]  }
   0x1   :  { %10 = vsyncpa [#allocation6], 0 }
   0x2   :  { %11 = vsyncpa [#allocation4], 0  ;;  %s382_s15 = smov [#allocation2]  }
   0x3   :  { %s17_s16 = sshll.u32 %s382_s15, 4  ;;  %s18_s16 = int_to_ptr.vmem [resolvable:$true] %s17_s16 }
   0x4   :  { %s324_s17 = scalar_lea.vmem %s18_s16, 256  ;;  %p329_p1 = scmp.lt.s32.totalorder %s18_s16, %s18_s16 }
   0x5   :  { %p325_p0 = scmp.ne.s32.totalorder %s18_s16, %s324_s17  ;;  %p330_p2 = scmp.lt.s32.totalorder %s324_s17, %s324_s17 }
   0x7   :  { %p331_p3 = por %p330_p2, %p329_p1 }
   0x9   :  { %p332_p4 = pnand %p331_p3, %p325_p0 }
   0xb   :  { %335 = shalt.err (!%p332_p4)
}
   0xc   :  { %s383_s18 = smov 128   ;;  %s384_s19 = smov 8  }
   0xd   :  { %23 = dma.hbm_to_vmem [thread:$0]  %s447_s0, 256, %s18_s16, [#allocation3], %s383_s18, %s383_s18, %s384_s19  }
   0xe   :  { %s385_s22 = smov [#allocation5]  }
   0xf   :  { %s29_s23 = sshll.u32 %s385_s22, 4  ;;  %s30_s23 = int_to_ptr.vmem [resolvable:$true] %s29_s23 }
  0x10   :  { %s344_s24 = scalar_lea.vmem %s30_s23, 512  ;;  %p349_p6 = scmp.lt.s32.totalorder %s30_s23, %s30_s23 }
  0x11   :  { %p345_p5 = scmp.ne.s32.totalorder %s30_s23, %s344_s24  ;;  %p350_p7 = scmp.lt.s32.totalorder %s344_s24, %s344_s24 }
  0x13   :  { %p351_p8 = por %p350_p7, %p349_p6 }
  0x15   :  { %p352_p9 = pnand %p351_p8, %p345_p5 }
  0x17   :  { %355 = shalt.err (!%p352_p9)
}
  0x18   :  { %35 = dma.hbm_to_vmem [thread:$0]  %s448_s1, 512, %s30_s23, [#allocation6], %s383_s18, %s383_s18, %s384_s19  }
  0x19   :  { %376 = dma.done.wait [#allocation3], 256  }
  0x1a   :  { %377 = vsyncadd [#allocation3], 4294967040 }
  0x1b   :  { %378 = dma.done.wait [#allocation6], 512  }
  0x1c   :  { %379 = vsyncadd [#allocation6], 4294966784  ;;  %vm59_vm0 = vcmask 261120   ;;  %v51_v0 = vld [vmem:[#allocation5 + $0x18] sm:$0xff]  ;;  %v50_v1 = vld [vmem:[#allocation5 + $0x10] sm:$0xff]  ;;  %v160_v18 = vlaneseq  ;;  %vm170_vm1 = vcmask 1041409  }
  0x1d   :  { %287 = vmatprep.subr.mxu0 %v51_v0  ;;  %v419_v2 = vld [vmem:[#allocation2] sm:$0xff]  ;;  %v49_v3 = vld [vmem:[#allocation5 + $0x8] sm:$0xff]  ;;  %v48_v4 = vld [vmem:[#allocation5] sm:$0xff]  ;;  %vm173_vm2 = vcmask 58368   ;;  %v386_v28 = vmov 0   ;;  %vm259_vm3 = vcmask 254976  }
  0x1e   :  { %288 = vmatpush3.msra.mxu0 %v51_v0  ;;  %295 = vmatprep.mubr.msk.f32.mxu0 %vm59_vm0, %v419_v2  ;;  %v423_v5 = vld [vmem:[#allocation2 + $0x8] sm:$0xff]  ;;  %v277_v6 = vld [vmem:[%s449_s2] ss:$0 sm:$0xff]  ;;  %v161_v19 = vand.u32 127, %v160_v18  ;;  %v163_v20 = vshrl.u32 %v160_v18, 7  ;;  %s387_s2 = smov [#allocation7]  }
  0x1f   :  { %289 = vmatprep.subr.mxu0 %v50_v1  ;;  %v280_v13 = vld [vmem:[%s450_s3] ss:$0 sm:$0xff]  ;;  %305 = vset.pattern.permute.xlu0 %v386_v28  ;;  %s267_s3 = sshll.u32 %s387_s2, 4  ;;  %s268_s3 = int_to_ptr.vmem [resolvable:$true] %s267_s3 }
  0x20   :  { %290 = vmatpush3.msra.mxu0 %v50_v1  ;;  %v164_v22 = vsub.s32 %v161_v19, %v163_v20  ;;  %304 = vset.pattern.permute.xlu1 %v386_v28  ;;  %v180_v29 = vsub.s32 0, %v163_v20  ;;  %v184_v30 = vsub.s32 1, %v163_v20  ;;  %s356_s29 = scalar_lea.vmem %s268_s3, 32  ;;  %p361_p11 = scmp.lt.s32.totalorder %s268_s3, %s268_s3 }
  0x21   :  { %291 = vmatprep.subr.mxu0 %v49_v3  ;;  %p357_p10 = scmp.ne.s32.totalorder %s268_s3, %s356_s29  ;;  %p362_p12 = scmp.lt.s32.totalorder %s356_s29, %s356_s29 }
  0x22   :  { %292 = vmatpush3.msra.mxu0 %v49_v3 }
  0x23   :  { %293 = vmatprep.subr.mxu0 %v48_v4  ;;  %p363_p13 = por %p362_p12, %p361_p11 }
  0x24   :  { %294 = vmatpush3.msra.mxu0 %v48_v4 }
  0x25   :  { %296 = vmatmul.mubr.msk.f32.vlgmr.msra.gmra.mxu0 %vm59_vm0, %v423_v5  ;;  %p364_p0 = pnand %p363_p13, %p357_p10 }
  0xe5   :  { %v297_v7 = vpop.f32.mrf.mxu0 }
  0xe6   :  { %v138_v8 = vadd.f32 %v297_v7, %v277_v6 }
  0xe7   :  { %v132_v9 = vpop.f32.mrf.mxu0 }
  0xe8   :  { %v133_v10 = vadd.f32 %v277_v6, %v132_v9  ;;  %306 = vtanh.f32 %v138_v8 }
  0xea   :  { %308 = vtanh.f32 %v133_v10 }
  0xf5   :  { %v307_v11 = vpop.eup %306 }
  0xf6   :  { %v151_v16 = vmul.f32 %v307_v11, %v280_v13 }
  0xf7   :  { %v309_v12 = vpop.eup %308 }
  0xf8   :  { %v150_v14 = vmul.f32 %v309_v12, %v280_v13  ;;  %v155_v17 = vsel %vm59_vm0, %v151_v16, 0.0 }
  0xfa   :  { %v152_v15 = vsel %vm59_vm0, %v150_v14, 0.0 }
  0xfb   :  { %153 = vadd.xlane.f32.xlu0 %v152_v15 }
  0xff   :  { %156 = vadd.xlane.f32.xlu0 %v155_v17 }
 0x184   :  { %v154_v21 = vpop.xlane.xlu0 %153 }
 0x185   :  { %v165_v24 = vrot.slane %v154_v21, %v164_v22 }
 0x188   :  { %v157_v23 = vpop.xlane.xlu0 %156 }
 0x189   :  { %v169_v25 = vrot.slane %v157_v23, %v164_v22 }
 0x18b   :  { %v171_v26 = vsel %vm170_vm1, %v169_v25, %v165_v24 }
 0x18c   :  { %v174_v27 = vsel %vm173_vm2, %v171_v26, -inf }
 0x18d   :  { %175 = vmax.xlane.f32.xlu1 %v174_v27 }
 0x216   :  { %v176_v31 = vpop.xlane.xlu1 %175 }
 0x217   :  { %v181_v32 = vrot.slane %v176_v31, %v180_v29  ;;  %v185_v33 = vrot.slane %v176_v31, %v184_v30 }
 0x219   :  { %v188_v34 = vsub.f32 %v154_v21, %v181_v32  ;;  %v189_v35 = vsub.f32 %v157_v23, %v185_v33 }
 0x21b   :  { %v190_v36 = vmul.f32 1.442695, %v188_v34  ;;  %v192_v37 = vmul.f32 1.442695, %v189_v35 }
 0x21d   :  { %310 = vpow2.f32 %v190_v36 }
 0x21e   :  { %312 = vpow2.f32 %v192_v37 }
 0x22a   :  { %v311_v38 = vpop.eup %310 }
 0x22b   :  { %v313_v39 = vpop.eup %312  ;;  %197 = vperm.xlu1 %304, %v311_v38  }
 0x22c   :  { %200 = vperm.xlu0 %305, %v313_v39  }
 0x2a6   :  { %v198_v40 = vpop.permute.xlu1 %197 }
 0x2a7   :  { %v201_v41 = vpop.permute.xlu0 %200  ;;  %v205_v42 = vrot.slane %v198_v40, %v164_v22 }
 0x2a8   :  { %v209_v43 = vrot.slane %v201_v41, %v164_v22 }
 0x2aa   :  { %v210_v44 = vsel %vm170_vm1, %v209_v43, %v205_v42 }
 0x2ab   :  { %v212_v45 = vsel %vm173_vm2, %v210_v44, 0.0 }
 0x2ac   :  { %213 = vadd.xlane.f32.xlu1 %v212_v45 }
 0x335   :  { %v214_v46 = vpop.xlane.xlu1 %213 }
 0x336   :  { %314 = vrcp.f32 %v214_v46 }
 0x343   :  { %v315_v47 = vpop.eup %314 }
 0x344   :  { %v220_v48 = vrot.slane %v315_v47, %v180_v29  ;;  %v224_v50 = vrot.slane %v315_v47, %v184_v30 }
 0x346   :  { %v227_v49 = vmul.f32 %v311_v38, %v220_v48  ;;  %v228_v51 = vmul.f32 %v313_v39, %v224_v50 }
 0x348   :  { %231 = vperm.xlu0 %305, %v227_v49  }
 0x34c   :  { %236 = vperm.xlu0 %305, %v228_v51  }
 0x3c3   :  { %v232_v52 = vpop.permute.xlu0 %231 }
 0x3c4   :  { %v239_v53 = vmul.f32 %v232_v52, %v419_v2 }
 0x3c6   :  { %v241_v54 = vsel %vm59_vm0, %v239_v53, 0.0 }
 0x3c7   :  { %v242_v55 = vrot.slane %v241_v54, 4  ;;  %v237_v56 = vpop.permute.xlu0 %236 }
 0x3c8   :  { %v240_v57 = vmul.f32 %v237_v56, %v423_v5 }
 0x3c9   :  { %v243_v58 = vadd.f32 %v242_v55, %v241_v54 }
 0x3ca   :  { %v248_v59 = vsel %vm59_vm0, %v240_v57, 0.0 }
 0x3cb   :  { %v244_v60 = vrot.slane %v243_v58, 2  ;;  %v249_v61 = vrot.slane %v248_v59, 4 }
 0x3cd   :  { %v245_v62 = vadd.f32 %v244_v60, %v243_v58  ;;  %v250_v63 = vadd.f32 %v249_v61, %v248_v59 }
 0x3cf   :  { %v251_v0 = vrot.slane %v250_v63, 2  ;;  %v246_v1 = vrot.slane %v245_v62, 1 }
 0x3d1   :  { %v252_v3 = vadd.f32 %v251_v0, %v250_v63  ;;  %v247_v2 = vadd.f32 %v246_v1, %v245_v62 }
 0x3d3   :  { %v253_v4 = vrot.slane %v252_v3, 1 }
 0x3d5   :  { %v254_v6 = vadd.f32 %v253_v4, %v252_v3 }
 0x3d7   :  { %v257_v7 = vsel %vm170_vm1, %v254_v6, %v247_v2 }
 0x3d8   :  { %260 = vst.msk [vmem:[#allocation7] sm:$0x3] %vm259_vm3, %v257_v7 }
 0x3d9   :  { %367 = shalt.err (!%p364_p0)
}
 0x3da   :  { %270 = dma.vmem_to_hbm [thread:$0]  %s268_s3, 32, %s451_s4, [#allocation4]  }
 0x3db   :  { %380 = dma.done.wait [#allocation4], 32  }
 0x3dc   :  { %381 = vsyncadd [#allocation4], 4294967264 }
 0x3dd   :  { %274 = vsyncpa [#allocation3], 1 }
 0x3de   :  { %275 = vsyncpa [#allocation6], 1 }
 0x3df   :  { %276 = vsyncpa [#allocation4], 1 }

</bundles_post_ra>
